<compile_context>
chip_gen: v7x
topology: tpu7x:2x2x1
jax: 0.10.0
libtpu: 0.0.40
codegen_flags: <defaults>
</compile_context>

<pallas_src>
import numpy as np
import jax
import jax.numpy as jnp
from jax.experimental import pallas as pl
from jax.experimental.pallas import tpu as pltpu

# ---------------------------------------------------------------------------
# Hyper-parameters consistent with EncoderRNN.__init__
# ---------------------------------------------------------------------------
N_CHARS = 30
N_WORDS = 50
HIDDEN_SIZE = 32                  # H
CHAR_EMBEDDING_DIM = 25           # E
CHAR_REPRESENTATION_DIM = 25      # C_r (conv out channels)
WORD_EMBED_DIM = HIDDEN_SIZE - CHAR_REPRESENTATION_DIM  # 7
SEQ_CHARS = 8                     # L characters per word
SEQ_WORDS = 6                     # T timesteps in the demo sequence


# ---------------------------------------------------------------------------
# Fused kernel: char-CNN + max-pool + input projection for ALL timesteps
# (pre-pass), then the T-step GRU recurrence fully unrolled with h in vregs.
# ---------------------------------------------------------------------------
def encoder_gru_kernel(x_ref,     # (T*(L+2), 3E) bf16  im2col'd padded char embeddings, all steps
                       wgi_ref,   # (T, 3H)       f32   word-embedding contribution to gi, all steps
                       h0_ref,    # (1, H)        f32   initial hidden state
                       cw_ref,    # (3E, C_r)     bf16  conv weight, im2col layout
                       cb_ref,    # (1, C_r)      f32   conv bias
                       wic_ref,   # (C_r, 3H)     bf16  input->gates weight (char part), gates [r|z|n]
                       wh_ref,    # (H, 3H)       f32   hidden->gates weight
                       bgi_ref,   # (1, 3H)       f32   folded bias: (b_ih+b_hh) for r,z ; b_ih for n
                       bhn_ref,   # (1, H)        f32   b_hh of the n gate (inside r * gh_n)
                       out_ref):  # (T, H)        f32   per-step hidden states
    T, H = out_ref.shape
    Lp2 = x_ref.shape[0] // T     # L + 2 conv output positions per word

    # ---------------- input-only pre-pass (off the recurrent path) ----------------
    # Char CNN for all T words as ONE im2col matmul on the MXU.
    conv = jnp.dot(x_ref[...], cw_ref[...],
                   preferred_element_type=jnp.float32)              # (T*(L+2), C_r) f32
    # Max-pool over the L+2 positions of each word; bias folded in AFTER the pool
    # (valid: per-output-channel bias is constant across the pooled axis).
    reps = [jnp.max(conv[t * Lp2:(t + 1) * Lp2, :], axis=0, keepdims=True)
            for t in range(T)]
    char_rep = jnp.concatenate(reps, axis=0) + cb_ref[...]          # (T, C_r) f32
    # Input->gates for all steps at once; the word part (wgi) was precomputed
    # outside the kernel, so the char/word concat is fully folded away.
    gi_all = (jnp.dot(char_rep.astype(wic_ref.dtype), wic_ref[...],
                      preferred_element_type=jnp.float32)
              + wgi_ref[...] + bgi_ref[...])                        # (T, 3H) f32

    # ---------------- GRU recurrence: gh matmul + gate elementwise only -----------
    wh = wh_ref[...]                                                # (H, 3H) f32
    bhn = bhn_ref[...]                                              # (1, H)  f32
    h = h0_ref[...]                                                 # (1, H)  f32
    outs = []
    for t in range(T):   # static full unroll (T small); h stays vreg-resident
        gi = gi_all[t:t + 1, :]                                     # (1, 3H) static slice
        gh = jnp.dot(h, wh, preferred_element_type=jnp.float32)     # (1, 3H) f32 matmul
        rz = jax.nn.sigmoid(gi[:, :2 * H] + gh[:, :2 * H])          # (1, 2H)
        r = rz[:, :H]
        z = rz[:, H:]
        n = jnp.tanh(gi[:, 2 * H:] + r * (gh[:, 2 * H:] + bhn))
        h = (1.0 - z) * n + z * h
        outs.append(h)

    # Single store of all per-step hidden states (one HBM writeback total).
    out_ref[...] = jnp.concatenate(outs, axis=0)


# ---------------------------------------------------------------------------
# One-time weight re-layout (NOT per step / per call).
# ---------------------------------------------------------------------------
def prepare_params(params):
    E, C_r, H = CHAR_EMBEDDING_DIM, CHAR_REPRESENTATION_DIM, HIDDEN_SIZE
    # conv weight (C_r, 1, 3, E) -> im2col layout (3E, C_r): row k*E+e, col o.
    cw = jnp.transpose(params["conv_w"][:, 0, :, :], (1, 2, 0)).reshape(3 * E, C_r)
    # GRU weights (3H, H_in) -> (H_in, 3H); gates [r|z|n] concatenated along lanes.
    w_i = params["w_ih"].T            # (H, 3H)
    w_h = params["w_hh"].T            # (H, 3H)
    b_ih, b_hh = params["b_ih"], params["b_hh"]
    # Fold (b_ih + b_hh) for the r,z gates; the n gate keeps b_hh separate (it sits
    # inside r * gh_n).
    b_gi = jnp.concatenate([b_ih[:2 * H] + b_hh[:2 * H], b_ih[2 * H:]]).reshape(1, 3 * H)
    # Precompute the word-embedding contribution to gi: (N_WORDS, Dw) @ (Dw, 3H).
    word_gi_table = params["word_embedding"] @ w_i[C_r:, :]          # (N_WORDS, 3H) f32
    return dict(
        char_embedding=params["char_embedding"],                 # (N_CHARS, E) f32
        word_gi_table=word_gi_table,                             # (N_WORDS, 3H) f32
        conv_w_im2col=cw.astype(jnp.bfloat16),                   # (3E, C_r)
        conv_b=params["conv_b"].reshape(1, C_r),                 # (1, C_r) f32
        w_i_char=w_i[:C_r, :].astype(jnp.bfloat16),              # (C_r, 3H)
        w_h=w_h.astype(jnp.float32),                             # (H, 3H)  f32 (recurrent path)
        b_gi=b_gi,                                               # (1, 3H) f32
        b_hn=b_hh[2 * H:].reshape(1, H),                         # (1, H) f32
    )


# ---------------------------------------------------------------------------
# Once-per-sequence glue: embedding gathers, padding, im2col, word-gi gather.
# ---------------------------------------------------------------------------
def _build_sequence_inputs(kparams, char_idx_seq, word_idx_seq):
    T, L = char_idx_seq.shape
    emb = kparams["char_embedding"][char_idx_seq]                 # (T, L, E)
    emb = jnp.pad(emb, ((0, 0), (2, 2), (0, 0)))                  # (T, L+4, E)  pad=(2,0)
    x = jnp.concatenate(                                          # im2col: (T, L+2, 3E)
        [emb[:, 0:L + 2], emb[:, 1:L + 3], emb[:, 2:L + 4]], axis=-1)
    x = x.reshape(T * (L + 2), -1).astype(jnp.bfloat16)           # (T*(L+2), 3E) bf16
    wgi = kparams["word_gi_table"][word_idx_seq]                  # (T, 3H) f32
    return x, wgi


# ---------------------------------------------------------------------------
# Sequence encoder: all T fused CNN+GRU steps in ONE pallas_call, one grid step.
# ---------------------------------------------------------------------------
def encoder_rnn_sequence(kparams, char_idx_seq, word_idx_seq, hidden0):
    T, L = char_idx_seq.shape
    H, C_r, E = HIDDEN_SIZE, CHAR_REPRESENTATION_DIM, CHAR_EMBEDDING_DIM
    Lp2 = L + 2

    x_seq, wgi_seq = _build_sequence_inputs(kparams, char_idx_seq, word_idx_seq)
    h0 = hidden0.reshape(1, H).astype(jnp.float32)

    out = pl.pallas_call(
        encoder_gru_kernel,
        out_shape=jax.ShapeDtypeStruct((T, H), jnp.float32),
        grid_spec=pltpu.PrefetchScalarGridSpec(
            num_scalar_prefetch=0,
            grid=(1,),                                            # everything in one step
            in_specs=[
                pl.BlockSpec((T * Lp2, 3 * E), lambda i: (0, 0)),   # im2col chars, all steps
                pl.BlockSpec((T, 3 * H), lambda i: (0, 0)),         # word gi, all steps
                pl.BlockSpec((1, H), lambda i: (0, 0)),             # h0
                pl.BlockSpec((3 * E, C_r), lambda i: (0, 0)),       # conv weight
                pl.BlockSpec((1, C_r), lambda i: (0, 0)),           # conv bias
                pl.BlockSpec((C_r, 3 * H), lambda i: (0, 0)),       # w_i (char part)
                pl.BlockSpec((H, 3 * H), lambda i: (0, 0)),         # w_h (f32)
                pl.BlockSpec((1, 3 * H), lambda i: (0, 0)),         # folded input bias
                pl.BlockSpec((1, H), lambda i: (0, 0)),             # n-gate hidden bias
            ],
            out_specs=pl.BlockSpec((T, H), lambda i: (0, 0)),
        ),
        compiler_params=pltpu.CompilerParams(
            dimension_semantics=("arbitrary",)),
    )(x_seq, wgi_seq, h0,
      kparams["conv_w_im2col"], kparams["conv_b"],
      kparams["w_i_char"], kparams["w_h"],
      kparams["b_gi"], kparams["b_hn"])

    output = out.reshape(T, 1, H)                    # matches torch GRU output layout
    hidden = out[-1].reshape(1, 1, H)                # final hidden state
    return output, hidden


def encoder_rnn_forward(kparams, char_indexes, word_index, hidden):
    """Single-step forward matching EncoderRNN.forward(char_indexes, word_index, hidden)."""
    out, hid = encoder_rnn_sequence(
        kparams, char_indexes.reshape(1, -1), jnp.reshape(word_index, (1,)), hidden)
    return out, hid


# ---------------------------------------------------------------------------
# Pure-JAX reference mirroring the PyTorch forward (for correctness check)
# ---------------------------------------------------------------------------
def reference_forward(params, char_indexes, word_index, hidden):
    H = HIDDEN_SIZE
    char_emb = params["char_embedding"][char_indexes[0]]            # (L, E)
    x = char_emb[None, None]                                        # (1,1,L,E) NCHW
    conv = jax.lax.conv_general_dilated(
        x, params["conv_w"], window_strides=(1, 1),
        padding=((2, 2), (0, 0)),
        dimension_numbers=("NCHW", "OIHW", "NCHW"),
        precision=jax.lax.Precision.HIGHEST)
    conv = conv + params["conv_b"][None, :, None, None]             # (1,C_r,L+2,1)
    conv = conv[:, :, :, 0]                                         # (1,C_r,L+2)
    char_rep = jnp.max(conv, axis=-1)                               # (1,C_r)
    word_emb = params["word_embedding"][word_index].reshape(1, -1)
    x_comb = jnp.concatenate([char_rep, word_emb], axis=1)          # (1,H)
    h = hidden.reshape(1, H)
    gi = x_comb @ params["w_ih"].T + params["b_ih"]
    gh = h @ params["w_hh"].T + params["b_hh"]
    r = jax.nn.sigmoid(gi[:, :H] + gh[:, :H])
    z = jax.nn.sigmoid(gi[:, H:2 * H] + gh[:, H:2 * H])
    n = jnp.tanh(gi[:, 2 * H:] + r * gh[:, 2 * H:])
    h_new = (1.0 - z) * n + z * h
    return h_new.reshape(1, 1, H), h_new.reshape(1, 1, H)


# ---------------------------------------------------------------------------
# Deterministic parameter init (shapes from EncoderRNN.__init__)
# ---------------------------------------------------------------------------
def init_params(key):
    ks = jax.random.split(key, 8)
    E, C_r, H = CHAR_EMBEDDING_DIM, CHAR_REPRESENTATION_DIM, HIDDEN_SIZE
    b_emb = float(np.sqrt(3.0 / E))            # matches init_embedding()
    b_conv = float(1.0 / np.sqrt(1 * 3 * E))
    k = float(1.0 / np.sqrt(H))
    return dict(
        char_embedding=jax.random.uniform(ks[0], (N_CHARS, E), jnp.float32, -b_emb, b_emb),
        conv_w=jax.random.uniform(ks[1], (C_r, 1, 3, E), jnp.float32, -b_conv, b_conv),
        conv_b=jax.random.uniform(ks[2], (C_r,), jnp.float32, -b_conv, b_conv),
        word_embedding=jax.random.normal(ks[3], (N_WORDS, WORD_EMBED_DIM), jnp.float32),
        w_ih=jax.random.uniform(ks[4], (3 * H, H), jnp.float32, -k, k),
        w_hh=jax.random.uniform(ks[5], (3 * H, H), jnp.float32, -k, k),
        b_ih=jax.random.uniform(ks[6], (3 * H,), jnp.float32, -k, k),
        b_hh=jax.random.uniform(ks[7], (3 * H,), jnp.float32, -k, k),
    )


if __name__ == "__main__":
    key = jax.random.PRNGKey(0)
    pkey, ckey, wkey, hkey = jax.random.split(key, 4)
    params = init_params(pkey)
    kparams = prepare_params(params)     # weight re-layout happens once, not per step

    T, L, H = SEQ_WORDS, SEQ_CHARS, HIDDEN_SIZE
    char_idx_seq = jax.random.randint(ckey, (T, L), 0, N_CHARS, dtype=jnp.int32)
    word_idx_seq = jax.random.randint(wkey, (T,), 0, N_WORDS, dtype=jnp.int32)
    hidden0 = 0.1 * jax.random.normal(hkey, (1, 1, H), jnp.float32)

    encode = jax.jit(encoder_rnn_sequence)
    out_seq, hid = encode(kparams, char_idx_seq, word_idx_seq, hidden0)
    out_seq = jax.block_until_ready(out_seq)
    hid = jax.block_until_ready(hid)

    # step-by-step pure-JAX reference over the same sequence
    h_ref = hidden0
    ref_outs = []
    for t in range(T):
        o, h_ref = reference_forward(params, char_idx_seq[t:t + 1], word_idx_seq[t], h_ref)
        ref_outs.append(o.reshape(1, H))
    ref_out_seq = jnp.stack(ref_outs)                   # (T, 1, H)

    assert out_seq.shape == (T, 1, H) and hid.shape == (1, 1, H)
    np.testing.assert_allclose(np.asarray(out_seq), np.asarray(ref_out_seq),
                               rtol=2e-2, atol=2e-2)
    np.testing.assert_allclose(np.asarray(hid), np.asarray(h_ref), rtol=2e-2, atol=2e-2)

    # single-step interface (matches the original EncoderRNN.forward signature)
    out1, hid1 = encoder_rnn_forward(kparams, char_idx_seq[0:1], word_idx_seq[0], hidden0)
    ref1_o, ref1_h = reference_forward(params, char_idx_seq[0:1], word_idx_seq[0], hidden0)
    np.testing.assert_allclose(np.asarray(out1), np.asarray(ref1_o), rtol=2e-2, atol=2e-2)
    np.testing.assert_allclose(np.asarray(hid1), np.asarray(ref1_h), rtol=2e-2, atol=2e-2)

    print("KERNEL_OK")
</pallas_src>

<mosaic_0001>
module attributes {stable_mosaic.version = 11 : i64} {
  func.func @encoder_gru_kernel(%arg0: i32, %arg1: memref<60x75xbf16, #tpu.memory_space<vmem>>, %arg2: memref<6x96xf32, #tpu.memory_space<vmem>>, %arg3: memref<1x32xf32, #tpu.memory_space<vmem>>, %arg4: memref<75x25xbf16, #tpu.memory_space<vmem>>, %arg5: memref<1x25xf32, #tpu.memory_space<vmem>>, %arg6: memref<25x96xbf16, #tpu.memory_space<vmem>>, %arg7: memref<32x96xf32, #tpu.memory_space<vmem>>, %arg8: memref<1x96xf32, #tpu.memory_space<vmem>>, %arg9: memref<1x32xf32, #tpu.memory_space<vmem>>, %arg10: memref<6x32xf32, #tpu.memory_space<vmem>>) attributes {dimension_semantics = [#tpu.dimension_semantics<arbitrary>], iteration_bounds = array<i64: 1>, scalar_prefetch = 0 : i64, scratch_operands = 0 : i64, tpu.core_type = #tpu.core_type<tc>, window_params = [{pipeline_mode = #tpu.pipeline_mode<synchronous>, transform_indices = @transform_0, window_bounds = array<i64: 60, 75>}, {pipeline_mode = #tpu.pipeline_mode<synchronous>, transform_indices = @transform_1, window_bounds = array<i64: 6, 96>}, {pipeline_mode = #tpu.pipeline_mode<synchronous>, transform_indices = @transform_2, window_bounds = array<i64: 1, 32>}, {pipeline_mode = #tpu.pipeline_mode<synchronous>, transform_indices = @transform_3, window_bounds = array<i64: 75, 25>}, {pipeline_mode = #tpu.pipeline_mode<synchronous>, transform_indices = @transform_4, window_bounds = array<i64: 1, 25>}, {pipeline_mode = #tpu.pipeline_mode<synchronous>, transform_indices = @transform_5, window_bounds = array<i64: 25, 96>}, {pipeline_mode = #tpu.pipeline_mode<synchronous>, transform_indices = @transform_6, window_bounds = array<i64: 32, 96>}, {pipeline_mode = #tpu.pipeline_mode<synchronous>, transform_indices = @transform_7, window_bounds = array<i64: 1, 96>}, {pipeline_mode = #tpu.pipeline_mode<synchronous>, transform_indices = @transform_8, window_bounds = array<i64: 1, 32>}, {pipeline_mode = #tpu.pipeline_mode<synchronous>, transform_indices = @transform_9, window_bounds = array<i64: 6, 32>}]} {
    %c0 = arith.constant 0 : index
    %c0_0 = arith.constant 0 : index
    %0 = vector.load %arg1[%c0, %c0_0] : memref<60x75xbf16, #tpu.memory_space<vmem>>, vector<60x75xbf16>
    %c0_1 = arith.constant 0 : index
    %c0_2 = arith.constant 0 : index
    %1 = vector.load %arg4[%c0_1, %c0_2] : memref<75x25xbf16, #tpu.memory_space<vmem>>, vector<75x25xbf16>
    %cst = arith.constant dense<0.000000e+00> : vector<60x25xf32>
    %2 = tpu.matmul %0, %1, %cst {dimension_numbers = #tpu.dot_dimension_numbers<[1], [0], [0], [1], [0, 0, 1, 1], [], []>} : vector<60x75xbf16>, vector<75x25xbf16>, vector<60x25xf32> -> vector<60x25xf32>
    %3 = vector.extract_strided_slice %2 {offsets = [0, 0], sizes = [10, 25], strides = [1, 1]} : vector<60x25xf32> to vector<10x25xf32>
    %cst_3 = arith.constant dense<0xFF800000> : vector<25xf32>
    %4 = vector.multi_reduction <maximumf>, %3, %cst_3 [0] : vector<10x25xf32> to vector<25xf32>
    %5 = vector.shape_cast %4 : vector<25xf32> to vector<1x25xf32>
    %6 = vector.extract_strided_slice %2 {offsets = [10, 0], sizes = [10, 25], strides = [1, 1]} : vector<60x25xf32> to vector<10x25xf32>
    %cst_4 = arith.constant dense<0xFF800000> : vector<25xf32>
    %7 = vector.multi_reduction <maximumf>, %6, %cst_4 [0] : vector<10x25xf32> to vector<25xf32>
    %8 = vector.shape_cast %7 : vector<25xf32> to vector<1x25xf32>
    %9 = vector.extract_strided_slice %2 {offsets = [20, 0], sizes = [10, 25], strides = [1, 1]} : vector<60x25xf32> to vector<10x25xf32>
    %cst_5 = arith.constant dense<0xFF800000> : vector<25xf32>
    %10 = vector.multi_reduction <maximumf>, %9, %cst_5 [0] : vector<10x25xf32> to vector<25xf32>
    %11 = vector.shape_cast %10 : vector<25xf32> to vector<1x25xf32>
    %12 = vector.extract_strided_slice %2 {offsets = [30, 0], sizes = [10, 25], strides = [1, 1]} : vector<60x25xf32> to vector<10x25xf32>
    %cst_6 = arith.constant dense<0xFF800000> : vector<25xf32>
    %13 = vector.multi_reduction <maximumf>, %12, %cst_6 [0] : vector<10x25xf32> to vector<25xf32>
    %14 = vector.shape_cast %13 : vector<25xf32> to vector<1x25xf32>
    %15 = vector.extract_strided_slice %2 {offsets = [40, 0], sizes = [10, 25], strides = [1, 1]} : vector<60x25xf32> to vector<10x25xf32>
    %cst_7 = arith.constant dense<0xFF800000> : vector<25xf32>
    %16 = vector.multi_reduction <maximumf>, %15, %cst_7 [0] : vector<10x25xf32> to vector<25xf32>
    %17 = vector.shape_cast %16 : vector<25xf32> to vector<1x25xf32>
    %18 = vector.extract_strided_slice %2 {offsets = [50, 0], sizes = [10, 25], strides = [1, 1]} : vector<60x25xf32> to vector<10x25xf32>
    %cst_8 = arith.constant dense<0xFF800000> : vector<25xf32>
    %19 = vector.multi_reduction <maximumf>, %18, %cst_8 [0] : vector<10x25xf32> to vector<25xf32>
    %20 = vector.shape_cast %19 : vector<25xf32> to vector<1x25xf32>
    %21 = tpu.concatenate %5, %8, %11, %14, %17, %20 in 0 : vector<1x25xf32>, vector<1x25xf32>, vector<1x25xf32>, vector<1x25xf32>, vector<1x25xf32>, vector<1x25xf32> -> vector<6x25xf32>
    %c0_9 = arith.constant 0 : index
    %c0_10 = arith.constant 0 : index
    %22 = vector.load %arg5[%c0_9, %c0_10] : memref<1x25xf32, #tpu.memory_space<vmem>>, vector<1x25xf32>
    %23 = vector.broadcast %22 : vector<1x25xf32> to vector<6x25xf32>
    %24 = arith.addf %21, %23 : vector<6x25xf32>
    %25 = arith.truncf %24 : vector<6x25xf32> to vector<6x25xbf16>
    %c0_11 = arith.constant 0 : index
    %c0_12 = arith.constant 0 : index
    %26 = vector.load %arg6[%c0_11, %c0_12] : memref<25x96xbf16, #tpu.memory_space<vmem>>, vector<25x96xbf16>
    %cst_13 = arith.constant dense<0.000000e+00> : vector<6x96xf32>
    %27 = tpu.matmul %25, %26, %cst_13 {dimension_numbers = #tpu.dot_dimension_numbers<[1], [0], [0], [1], [0, 0, 1, 1], [], []>} : vector<6x25xbf16>, vector<25x96xbf16>, vector<6x96xf32> -> vector<6x96xf32>
    %c0_14 = arith.constant 0 : index
    %c0_15 = arith.constant 0 : index
    %28 = vector.load %arg2[%c0_14, %c0_15] : memref<6x96xf32, #tpu.memory_space<vmem>>, vector<6x96xf32>
    %29 = arith.addf %27, %28 : vector<6x96xf32>
    %c0_16 = arith.constant 0 : index
    %c0_17 = arith.constant 0 : index
    %30 = vector.load %arg8[%c0_16, %c0_17] : memref<1x96xf32, #tpu.memory_space<vmem>>, vector<1x96xf32>
    %31 = vector.broadcast %30 : vector<1x96xf32> to vector<6x96xf32>
    %32 = arith.addf %29, %31 : vector<6x96xf32>
    %c0_18 = arith.constant 0 : index
    %c0_19 = arith.constant 0 : index
    %33 = vector.load %arg7[%c0_18, %c0_19] : memref<32x96xf32, #tpu.memory_space<vmem>>, vector<32x96xf32>
    %c0_20 = arith.constant 0 : index
    %c0_21 = arith.constant 0 : index
    %34 = vector.load %arg9[%c0_20, %c0_21] : memref<1x32xf32, #tpu.memory_space<vmem>>, vector<1x32xf32>
    %c0_22 = arith.constant 0 : index
    %c0_23 = arith.constant 0 : index
    %35 = vector.load %arg3[%c0_22, %c0_23] : memref<1x32xf32, #tpu.memory_space<vmem>>, vector<1x32xf32>
    %36 = vector.extract_strided_slice %32 {offsets = [0, 0], sizes = [1, 96], strides = [1, 1]} : vector<6x96xf32> to vector<1x96xf32>
    %cst_24 = arith.constant dense<0.000000e+00> : vector<1x96xf32>
    %37 = tpu.matmul %35, %33, %cst_24 {dimension_numbers = #tpu.dot_dimension_numbers<[1], [0], [0], [1], [0, 0, 1, 1], [], []>} : vector<1x32xf32>, vector<32x96xf32>, vector<1x96xf32> -> vector<1x96xf32>
    %38 = vector.extract_strided_slice %36 {offsets = [0, 0], sizes = [1, 64], strides = [1, 1]} : vector<1x96xf32> to vector<1x64xf32>
    %39 = vector.extract_strided_slice %37 {offsets = [0, 0], sizes = [1, 64], strides = [1, 1]} : vector<1x96xf32> to vector<1x64xf32>
    %40 = arith.addf %38, %39 : vector<1x64xf32>
    %41 = arith.negf %40 : vector<1x64xf32>
    %42 = math.exp %41 : vector<1x64xf32>
    %cst_25 = arith.constant 1.000000e+00 : f32
    %43 = vector.broadcast %cst_25 : f32 to vector<1x64xf32>
    %44 = arith.addf %43, %42 : vector<1x64xf32>
    %45 = arith.divf %43, %44 : vector<1x64xf32>
    %46 = vector.extract_strided_slice %45 {offsets = [0, 0], sizes = [1, 32], strides = [1, 1]} : vector<1x64xf32> to vector<1x32xf32>
    %47 = vector.extract_strided_slice %45 {offsets = [0, 32], sizes = [1, 32], strides = [1, 1]} : vector<1x64xf32> to vector<1x32xf32>
    %48 = vector.extract_strided_slice %36 {offsets = [0, 64], sizes = [1, 32], strides = [1, 1]} : vector<1x96xf32> to vector<1x32xf32>
    %49 = vector.extract_strided_slice %37 {offsets = [0, 64], sizes = [1, 32], strides = [1, 1]} : vector<1x96xf32> to vector<1x32xf32>
    %50 = arith.addf %49, %34 : vector<1x32xf32>
    %51 = arith.mulf %46, %50 : vector<1x32xf32>
    %52 = arith.addf %48, %51 : vector<1x32xf32>
    %53 = math.tanh %52 : vector<1x32xf32>
    %cst_26 = arith.constant 1.000000e+00 : f32
    %54 = vector.broadcast %cst_26 : f32 to vector<1x32xf32>
    %55 = arith.subf %54, %47 : vector<1x32xf32>
    %56 = arith.mulf %55, %53 : vector<1x32xf32>
    %57 = arith.mulf %47, %35 : vector<1x32xf32>
    %58 = arith.addf %56, %57 : vector<1x32xf32>
    %59 = vector.extract_strided_slice %32 {offsets = [1, 0], sizes = [1, 96], strides = [1, 1]} : vector<6x96xf32> to vector<1x96xf32>
    %cst_27 = arith.constant dense<0.000000e+00> : vector<1x96xf32>
    %60 = tpu.matmul %58, %33, %cst_27 {dimension_numbers = #tpu.dot_dimension_numbers<[1], [0], [0], [1], [0, 0, 1, 1], [], []>} : vector<1x32xf32>, vector<32x96xf32>, vector<1x96xf32> -> vector<1x96xf32>
    %61 = vector.extract_strided_slice %59 {offsets = [0, 0], sizes = [1, 64], strides = [1, 1]} : vector<1x96xf32> to vector<1x64xf32>
    %62 = vector.extract_strided_slice %60 {offsets = [0, 0], sizes = [1, 64], strides = [1, 1]} : vector<1x96xf32> to vector<1x64xf32>
    %63 = arith.addf %61, %62 : vector<1x64xf32>
    %64 = arith.negf %63 : vector<1x64xf32>
    %65 = math.exp %64 : vector<1x64xf32>
    %cst_28 = arith.constant 1.000000e+00 : f32
    %66 = vector.broadcast %cst_28 : f32 to vector<1x64xf32>
    %67 = arith.addf %66, %65 : vector<1x64xf32>
    %68 = arith.divf %66, %67 : vector<1x64xf32>
    %69 = vector.extract_strided_slice %68 {offsets = [0, 0], sizes = [1, 32], strides = [1, 1]} : vector<1x64xf32> to vector<1x32xf32>
    %70 = vector.extract_strided_slice %68 {offsets = [0, 32], sizes = [1, 32], strides = [1, 1]} : vector<1x64xf32> to vector<1x32xf32>
    %71 = vector.extract_strided_slice %59 {offsets = [0, 64], sizes = [1, 32], strides = [1, 1]} : vector<1x96xf32> to vector<1x32xf32>
    %72 = vector.extract_strided_slice %60 {offsets = [0, 64], sizes = [1, 32], strides = [1, 1]} : vector<1x96xf32> to vector<1x32xf32>
    %73 = arith.addf %72, %34 : vector<1x32xf32>
    %74 = arith.mulf %69, %73 : vector<1x32xf32>
    %75 = arith.addf %71, %74 : vector<1x32xf32>
    %76 = math.tanh %75 : vector<1x32xf32>
    %cst_29 = arith.constant 1.000000e+00 : f32
    %77 = vector.broadcast %cst_29 : f32 to vector<1x32xf32>
    %78 = arith.subf %77, %70 : vector<1x32xf32>
    %79 = arith.mulf %78, %76 : vector<1x32xf32>
    %80 = arith.mulf %70, %58 : vector<1x32xf32>
    %81 = arith.addf %79, %80 : vector<1x32xf32>
    %82 = vector.extract_strided_slice %32 {offsets = [2, 0], sizes = [1, 96], strides = [1, 1]} : vector<6x96xf32> to vector<1x96xf32>
    %cst_30 = arith.constant dense<0.000000e+00> : vector<1x96xf32>
    %83 = tpu.matmul %81, %33, %cst_30 {dimension_numbers = #tpu.dot_dimension_numbers<[1], [0], [0], [1], [0, 0, 1, 1], [], []>} : vector<1x32xf32>, vector<32x96xf32>, vector<1x96xf32> -> vector<1x96xf32>
    %84 = vector.extract_strided_slice %82 {offsets = [0, 0], sizes = [1, 64], strides = [1, 1]} : vector<1x96xf32> to vector<1x64xf32>
    %85 = vector.extract_strided_slice %83 {offsets = [0, 0], sizes = [1, 64], strides = [1, 1]} : vector<1x96xf32> to vector<1x64xf32>
    %86 = arith.addf %84, %85 : vector<1x64xf32>
    %87 = arith.negf %86 : vector<1x64xf32>
    %88 = math.exp %87 : vector<1x64xf32>
    %cst_31 = arith.constant 1.000000e+00 : f32
    %89 = vector.broadcast %cst_31 : f32 to vector<1x64xf32>
    %90 = arith.addf %89, %88 : vector<1x64xf32>
    %91 = arith.divf %89, %90 : vector<1x64xf32>
    %92 = vector.extract_strided_slice %91 {offsets = [0, 0], sizes = [1, 32], strides = [1, 1]} : vector<1x64xf32> to vector<1x32xf32>
    %93 = vector.extract_strided_slice %91 {offsets = [0, 32], sizes = [1, 32], strides = [1, 1]} : vector<1x64xf32> to vector<1x32xf32>
    %94 = vector.extract_strided_slice %82 {offsets = [0, 64], sizes = [1, 32], strides = [1, 1]} : vector<1x96xf32> to vector<1x32xf32>
    %95 = vector.extract_strided_slice %83 {offsets = [0, 64], sizes = [1, 32], strides = [1, 1]} : vector<1x96xf32> to vector<1x32xf32>
    %96 = arith.addf %95, %34 : vector<1x32xf32>
    %97 = arith.mulf %92, %96 : vector<1x32xf32>
    %98 = arith.addf %94, %97 : vector<1x32xf32>
    %99 = math.tanh %98 : vector<1x32xf32>
    %cst_32 = arith.constant 1.000000e+00 : f32
    %100 = vector.broadcast %cst_32 : f32 to vector<1x32xf32>
    %101 = arith.subf %100, %93 : vector<1x32xf32>
    %102 = arith.mulf %101, %99 : vector<1x32xf32>
    %103 = arith.mulf %93, %81 : vector<1x32xf32>
    %104 = arith.addf %102, %103 : vector<1x32xf32>
    %105 = vector.extract_strided_slice %32 {offsets = [3, 0], sizes = [1, 96], strides = [1, 1]} : vector<6x96xf32> to vector<1x96xf32>
    %cst_33 = arith.constant dense<0.000000e+00> : vector<1x96xf32>
    %106 = tpu.matmul %104, %33, %cst_33 {dimension_numbers = #tpu.dot_dimension_numbers<[1], [0], [0], [1], [0, 0, 1, 1], [], []>} : vector<1x32xf32>, vector<32x96xf32>, vector<1x96xf32> -> vector<1x96xf32>
    %107 = vector.extract_strided_slice %105 {offsets = [0, 0], sizes = [1, 64], strides = [1, 1]} : vector<1x96xf32> to vector<1x64xf32>
    %108 = vector.extract_strided_slice %106 {offsets = [0, 0], sizes = [1, 64], strides = [1, 1]} : vector<1x96xf32> to vector<1x64xf32>
    %109 = arith.addf %107, %108 : vector<1x64xf32>
    %110 = arith.negf %109 : vector<1x64xf32>
    %111 = math.exp %110 : vector<1x64xf32>
    %cst_34 = arith.constant 1.000000e+00 : f32
    %112 = vector.broadcast %cst_34 : f32 to vector<1x64xf32>
    %113 = arith.addf %112, %111 : vector<1x64xf32>
    %114 = arith.divf %112, %113 : vector<1x64xf32>
    %115 = vector.extract_strided_slice %114 {offsets = [0, 0], sizes = [1, 32], strides = [1, 1]} : vector<1x64xf32> to vector<1x32xf32>
    %116 = vector.extract_strided_slice %114 {offsets = [0, 32], sizes = [1, 32], strides = [1, 1]} : vector<1x64xf32> to vector<1x32xf32>
    %117 = vector.extract_strided_slice %105 {offsets = [0, 64], sizes = [1, 32], strides = [1, 1]} : vector<1x96xf32> to vector<1x32xf32>
    %118 = vector.extract_strided_slice %106 {offsets = [0, 64], sizes = [1, 32], strides = [1, 1]} : vector<1x96xf32> to vector<1x32xf32>
    %119 = arith.addf %118, %34 : vector<1x32xf32>
    %120 = arith.mulf %115, %119 : vector<1x32xf32>
    %121 = arith.addf %117, %120 : vector<1x32xf32>
    %122 = math.tanh %121 : vector<1x32xf32>
    %cst_35 = arith.constant 1.000000e+00 : f32
    %123 = vector.broadcast %cst_35 : f32 to vector<1x32xf32>
    %124 = arith.subf %123, %116 : vector<1x32xf32>
    %125 = arith.mulf %124, %122 : vector<1x32xf32>
    %126 = arith.mulf %116, %104 : vector<1x32xf32>
    %127 = arith.addf %125, %126 : vector<1x32xf32>
    %128 = vector.extract_strided_slice %32 {offsets = [4, 0], sizes = [1, 96], strides = [1, 1]} : vector<6x96xf32> to vector<1x96xf32>
    %cst_36 = arith.constant dense<0.000000e+00> : vector<1x96xf32>
    %129 = tpu.matmul %127, %33, %cst_36 {dimension_numbers = #tpu.dot_dimension_numbers<[1], [0], [0], [1], [0, 0, 1, 1], [], []>} : vector<1x32xf32>, vector<32x96xf32>, vector<1x96xf32> -> vector<1x96xf32>
    %130 = vector.extract_strided_slice %128 {offsets = [0, 0], sizes = [1, 64], strides = [1, 1]} : vector<1x96xf32> to vector<1x64xf32>
    %131 = vector.extract_strided_slice %129 {offsets = [0, 0], sizes = [1, 64], strides = [1, 1]} : vector<1x96xf32> to vector<1x64xf32>
    %132 = arith.addf %130, %131 : vector<1x64xf32>
    %133 = arith.negf %132 : vector<1x64xf32>
    %134 = math.exp %133 : vector<1x64xf32>
    %cst_37 = arith.constant 1.000000e+00 : f32
    %135 = vector.broadcast %cst_37 : f32 to vector<1x64xf32>
    %136 = arith.addf %135, %134 : vector<1x64xf32>
    %137 = arith.divf %135, %136 : vector<1x64xf32>
    %138 = vector.extract_strided_slice %137 {offsets = [0, 0], sizes = [1, 32], strides = [1, 1]} : vector<1x64xf32> to vector<1x32xf32>
    %139 = vector.extract_strided_slice %137 {offsets = [0, 32], sizes = [1, 32], strides = [1, 1]} : vector<1x64xf32> to vector<1x32xf32>
    %140 = vector.extract_strided_slice %128 {offsets = [0, 64], sizes = [1, 32], strides = [1, 1]} : vector<1x96xf32> to vector<1x32xf32>
    %141 = vector.extract_strided_slice %129 {offsets = [0, 64], sizes = [1, 32], strides = [1, 1]} : vector<1x96xf32> to vector<1x32xf32>
    %142 = arith.addf %141, %34 : vector<1x32xf32>
    %143 = arith.mulf %138, %142 : vector<1x32xf32>
    %144 = arith.addf %140, %143 : vector<1x32xf32>
    %145 = math.tanh %144 : vector<1x32xf32>
    %cst_38 = arith.constant 1.000000e+00 : f32
    %146 = vector.broadcast %cst_38 : f32 to vector<1x32xf32>
    %147 = arith.subf %146, %139 : vector<1x32xf32>
    %148 = arith.mulf %147, %145 : vector<1x32xf32>
    %149 = arith.mulf %139, %127 : vector<1x32xf32>
    %150 = arith.addf %148, %149 : vector<1x32xf32>
    %151 = vector.extract_strided_slice %32 {offsets = [5, 0], sizes = [1, 96], strides = [1, 1]} : vector<6x96xf32> to vector<1x96xf32>
    %cst_39 = arith.constant dense<0.000000e+00> : vector<1x96xf32>
    %152 = tpu.matmul %150, %33, %cst_39 {dimension_numbers = #tpu.dot_dimension_numbers<[1], [0], [0], [1], [0, 0, 1, 1], [], []>} : vector<1x32xf32>, vector<32x96xf32>, vector<1x96xf32> -> vector<1x96xf32>
    %153 = vector.extract_strided_slice %151 {offsets = [0, 0], sizes = [1, 64], strides = [1, 1]} : vector<1x96xf32> to vector<1x64xf32>
    %154 = vector.extract_strided_slice %152 {offsets = [0, 0], sizes = [1, 64], strides = [1, 1]} : vector<1x96xf32> to vector<1x64xf32>
    %155 = arith.addf %153, %154 : vector<1x64xf32>
    %156 = arith.negf %155 : vector<1x64xf32>
    %157 = math.exp %156 : vector<1x64xf32>
    %cst_40 = arith.constant 1.000000e+00 : f32
    %158 = vector.broadcast %cst_40 : f32 to vector<1x64xf32>
    %159 = arith.addf %158, %157 : vector<1x64xf32>
    %160 = arith.divf %158, %159 : vector<1x64xf32>
    %161 = vector.extract_strided_slice %160 {offsets = [0, 0], sizes = [1, 32], strides = [1, 1]} : vector<1x64xf32> to vector<1x32xf32>
    %162 = vector.extract_strided_slice %160 {offsets = [0, 32], sizes = [1, 32], strides = [1, 1]} : vector<1x64xf32> to vector<1x32xf32>
    %163 = vector.extract_strided_slice %151 {offsets = [0, 64], sizes = [1, 32], strides = [1, 1]} : vector<1x96xf32> to vector<1x32xf32>
    %164 = vector.extract_strided_slice %152 {offsets = [0, 64], sizes = [1, 32], strides = [1, 1]} : vector<1x96xf32> to vector<1x32xf32>
    %165 = arith.addf %164, %34 : vector<1x32xf32>
    %166 = arith.mulf %161, %165 : vector<1x32xf32>
    %167 = arith.addf %163, %166 : vector<1x32xf32>
    %168 = math.tanh %167 : vector<1x32xf32>
    %cst_41 = arith.constant 1.000000e+00 : f32
    %169 = vector.broadcast %cst_41 : f32 to vector<1x32xf32>
    %170 = arith.subf %169, %162 : vector<1x32xf32>
    %171 = arith.mulf %170, %168 : vector<1x32xf32>
    %172 = arith.mulf %162, %150 : vector<1x32xf32>
    %173 = arith.addf %171, %172 : vector<1x32xf32>
    %174 = tpu.concatenate %58, %81, %104, %127, %150, %173 in 0 : vector<1x32xf32>, vector<1x32xf32>, vector<1x32xf32>, vector<1x32xf32>, vector<1x32xf32>, vector<1x32xf32> -> vector<6x32xf32>
    %c0_42 = arith.constant 0 : index
    %c0_43 = arith.constant 0 : index
    %175 = vector.load %arg10[%c0_42, %c0_43] : memref<6x32xf32, #tpu.memory_space<vmem>>, vector<6x32xf32>
    tpu.vector_store %arg10[%c0_42, %c0_43], %174 {strides = array<i32>} : memref<6x32xf32, #tpu.memory_space<vmem>>, vector<6x32xf32>,
    return
  }
  func.func @transform_0(%arg0: i32) -> (i32, i32) {
    %c0_i32 = arith.constant 0 : i32
    %c0_i32_0 = arith.constant 0 : i32
    %c0_i32_1 = arith.constant 0 : i32
    return %c0_i32, %c0_i32_0 : i32, i32
  }
  func.func @transform_1(%arg0: i32) -> (i32, i32) {
    %c0_i32 = arith.constant 0 : i32
    %c0_i32_0 = arith.constant 0 : i32
    %c0_i32_1 = arith.constant 0 : i32
    return %c0_i32, %c0_i32_0 : i32, i32
  }
  func.func @transform_2(%arg0: i32) -> (i32, i32) {
    %c0_i32 = arith.constant 0 : i32
    %c0_i32_0 = arith.constant 0 : i32
    %c0_i32_1 = arith.constant 0 : i32
    return %c0_i32, %c0_i32_0 : i32, i32
  }
  func.func @transform_3(%arg0: i32) -> (i32, i32) {
    %c0_i32 = arith.constant 0 : i32
    %c0_i32_0 = arith.constant 0 : i32
    %c0_i32_1 = arith.constant 0 : i32
    return %c0_i32, %c0_i32_0 : i32, i32
  }
  func.func @transform_4(%arg0: i32) -> (i32, i32) {
    %c0_i32 = arith.constant 0 : i32
    %c0_i32_0 = arith.constant 0 : i32
    %c0_i32_1 = arith.constant 0 : i32
    return %c0_i32, %c0_i32_0 : i32, i32
  }
  func.func @transform_5(%arg0: i32) -> (i32, i32) {
    %c0_i32 = arith.constant 0 : i32
    %c0_i32_0 = arith.constant 0 : i32
    %c0_i32_1 = arith.constant 0 : i32
    return %c0_i32, %c0_i32_0 : i32, i32
  }
  func.func @transform_6(%arg0: i32) -> (i32, i32) {
    %c0_i32 = arith.constant 0 : i32
    %c0_i32_0 = arith.constant 0 : i32
    %c0_i32_1 = arith.constant 0 : i32
    return %c0_i32, %c0_i32_0 : i32, i32
  }
  func.func @transform_7(%arg0: i32) -> (i32, i32) {
    %c0_i32 = arith.constant 0 : i32
    %c0_i32_0 = arith.constant 0 : i32
    %c0_i32_1 = arith.constant 0 : i32
    return %c0_i32, %c0_i32_0 : i32, i32
  }
  func.func @transform_8(%arg0: i32) -> (i32, i32) {
    %c0_i32 = arith.constant 0 : i32
    %c0_i32_0 = arith.constant 0 : i32
    %c0_i32_1 = arith.constant 0 : i32
    return %c0_i32, %c0_i32_0 : i32, i32
  }
  func.func @transform_9(%arg0: i32) -> (i32, i32) {
    %c0_i32 = arith.constant 0 : i32
    %c0_i32_0 = arith.constant 0 : i32
    %c0_i32_1 = arith.constant 0 : i32
    return %c0_i32, %c0_i32_0 : i32, i32
  }
}

</mosaic_0001>

<bundles_post_ra>
// kernel: encoder_rnn_sequence.1
= control target key start
LH: loop header
LB: loop body
LE: loop exit
PB: predicated region body
PF: predicated region fallthrough
CT: control target
= control target key end

     0   :  { %vm113_vm0 = vcmask 1044480   ;;  %vm100_vm1 = vcmask 613376   ;;  %vm114_vm2 = vcmask 1045504   ;;  %v1272_v4 = vmov 65535   ;;  %s1276_s17 = smov 64   ;;  %s1521_s3 = inlined_call_operand.vmem [shape: bf16[75,25], index: 3, kind: input, shape index: {}]   ;;  %s1522_s0 = inlined_call_operand.vmem [shape: bf16[60,75], index: 0, kind: input, shape index: {}]   ;;  %s1523_s5 = inlined_call_operand.vmem [shape: bf16[25,96], index: 5, kind: input, shape index: {}]   ;;  %s1524_s6 = inlined_call_operand.vmem [shape: f32[32,96], index: 6, kind: input, shape index: {}]   ;;  %s1525_s8 = inlined_call_operand.vmem [shape: f32[1,32], index: 8, kind: input, shape index: {}]   ;;  %s1526_s4 = inlined_call_operand.vmem [shape: f32[1,25], index: 4, kind: input, shape index: {}]   ;;  %s1527_s2 = inlined_call_operand.vmem [shape: f32[1,32], index: 2, kind: input, shape index: {}]   ;;  %s1528_s1 = inlined_call_operand.vmem [shape: f32[6,96], index: 1, kind: input, shape index: {}]   ;;  %s1529_s7 = inlined_call_operand.vmem [shape: f32[1,96], index: 7, kind: input, shape index: {}]   ;;  %s1530_s9 = inlined_call_operand.vmem [shape: f32[6,32], index: 9, kind: output, shape index: {}]  }
   0x1   :  { %v1225_v0 = vld [vmem:[%s1521_s3] sm:$0xff]   ;;  %v1226_v1 = vld [vmem:[%s1521_s3 + $0x8] sm:$0xff]   ;;  %v1227_v2 = vld [vmem:[%s1521_s3 + $0x10] sm:$0xff]   ;;  %v115_v5 = vsel %vm113_vm0, 4294967295, %v1272_v4  ;;  %v1273_v14 = vmov 0.0   ;;  %vm252_vm3 = vcmask 1043456  }
   0x2   :  { %1090 = vmatprep.subr.bf16.mxu0 %v1225_v0  ;;  %v1230_v3 = vld [vmem:[%s1522_s0] sm:$0xff]   ;;  %v1228_v6 = vld [vmem:[%s1521_s3 + $0x18] sm:$0xff]   ;;  %v116_v8 = vsel %vm114_vm2, %v115_v5, 0  ;;  %v1231_v10 = vld [vmem:[%s1522_s0 + $0x8] sm:$0xff]   ;;  %1108 = vmatprep.subr.bf16.mxu1 %v1273_v14  ;;  %v283_v16 = vsel %vm252_vm3, 4294967295, %v1272_v4  ;;  %vm1274_vm4 = vmmov 0  }
   0x3   :  { %1091 = vmatpush3.bf16.msra.mxu0 %v1225_v0  ;;  %1100 = vmatprep.mubr.msk.bf16.mxu0 %vm100_vm1, %v1230_v3  ;;  %v1229_v7 = vld [vmem:[%s1521_s3 + $0x20] sm:$0x3f]   ;;  %v1232_v11 = vld [vmem:[%s1522_s0 + $0x10] sm:$0xff]   ;;  %v1233_v12 = vld [vmem:[%s1522_s0 + $0x18] sm:$0x3f]   ;;  %v284_v17 = vsel %vm113_vm0, %v283_v16, 0 }
   0x4   :  { %1092 = vmatprep.subr.bf16.mxu0 %v1226_v1  ;;  %v118_v9 = vand.u32 %v1229_v7, %v116_v8  ;;  %v1234_v13 = vld [vmem:[%s1523_s5] sm:$0xff]   ;;  %v1235_v15 = vld [vmem:[%s1523_s5 + $0x8] sm:$0x1f]   ;;  %1112 = vmatprep.mubr.msk.bf16.mxu1 %vm1274_vm4, %v1273_v14  ;;  %v1275_v19 = vmov 0.0|0.0   ;;  %v338_v23 = vld [vmem:[%s1524_s6 + $0x10] sm:$0xff]  ;;  %vm207_vm5 = vcmask 203780  }
   0x5   :  { %1109 = vmatpush3.bf16.msra.mxu1 %v1234_v13  ;;  %v286_v18 = vand.u32 %v1235_v15, %v284_v17  ;;  %v336_v20 = vld [vmem:[%s1524_s6] sm:$0xff]  ;;  %v337_v21 = vld [vmem:[%s1524_s6 + $0x8] sm:$0xff]  ;;  %v339_v24 = vld [vmem:[%s1524_s6 + $0x18] sm:$0xff]  ;;  %vm209_vm6 = vcmask 201728   ;;  %vm198_vm7 = vcmask 199680   ;;  %vm185_vm8 = vcmask 203776  }
   0x6   :  { %1110 = vmatprep.subr.bf16.mxu1 %v1273_v14  ;;  %v1383_v22 = vpack.c.bf16 %v337_v21, %v336_v20  ;;  %v1393_v25 = vpack.c.bf16 %v339_v24, %v338_v23  ;;  %v1037_v26 = vld [vmem:[%s1525_s8] ss:$0 sm:$0xff]  ;;  %vm187_vm9 = vcmask 197632   ;;  %vm196_vm10 = vcmask 203778  }
   0x7   :  { %1093 = vmatpush3.bf16.msra.mxu0 %v1226_v1  ;;  %428 = vrot.lane.b32.xlu0 %v1037_v26, %s1276_s17  ;;  %vm218_vm11 = vcmask 203782   ;;  %vm246_vm12 = vcmask 1040384   ;;  %vm248_vm13 = vcmask 1041408   ;;  %vm250_vm14 = vcmask 1042432  }
   0x8   :  { %1094 = vmatprep.subr.bf16.mxu0 %v1227_v2  ;;  %vm342_vm15 = vcmask 261120  }
   0x9   :  { %1111 = vmatpush3.bf16.msra.mxu1 %v286_v18 }
   0xa   :  { %1182 = vmatprep.subr.bf16.mxu1 %v1275_v19 }
   0xb   :  { %1095 = vmatpush3.bf16.msra.mxu0 %v1227_v2 }
   0xc   :  { %1096 = vmatprep.subr.bf16.mxu0 %v1228_v6 }
   0xf   :  { %1097 = vmatpush3.bf16.msra.mxu0 %v1228_v6 }
  0x10   :  { %1098 = vmatprep.subr.bf16.mxu0 %v118_v9 }
  0x13   :  { %1099 = vmatpush3.bf16.msra.mxu0 %v118_v9 }
  0x14   :  { %1200 = vmatprep.subr.bf16.mxu0 %v1275_v19 }
  0x16   :  { %1101 = vmatmul.mubr.msk.bf16.vlgmr.msra.gmra.mrb[0].mxu0 %vm100_vm1, %v1231_v10 }
  0x17   :  { %1104 = vmatprep.mubr.msk.bf16.mxu0 %vm100_vm1, %v1232_v11  ;;  %1202 = vmatpush3.bf16.msra.mxu0 %v1383_v22 }
  0x18   :  { %1203 = vmatprep.subr.bf16.mxu0 %v1275_v19 }
  0x1b   :  { %1205 = vmatpush3.bf16.msra.mxu0 %v1393_v25 }
  0x1c   :  { %1212 = vmatprep.subr.bf16.mxu0 %v1275_v19 }
  0x1e   :  { %1105 = vmatmul.mubr.msk.bf16.gmra.mrb[4].mxu0 %vm100_vm1, %v1233_v12  ;;  %vm1011_vm1 = vcmask 259072  }
  0x1f   :  { %1157 = vmatprep.mubr.msk.f32.mxu0 %vm1274_vm4, %v1273_v14 }
  0xe9   :  { %v1102_v27 = vpop.f32.mrb[0].mxu0 }
  0xea   :  { %v154_v28 = vpop.f32.mrb[1].mxu0  ;;  %v208_v30 = vsel %vm207_vm5, %v1102_v27, -inf  ;;  %v199_v33 = vsel %vm198_vm7, %v1102_v27, -inf }
  0xeb   :  { %v1103_v29 = vpop.f32.mrb[2].mxu0  ;;  %v186_v34 = vsel %vm185_vm8, %v154_v28, -inf }
  0xec   :  { %v210_v31 = vsel %vm209_vm6, %v1103_v29, -inf  ;;  %v157_v32 = vpop.f32.mrb[3].mxu0  ;;  %v219_v49 = vsel %vm218_vm11, %v1103_v29, -inf }
  0xed   :  { %v211_v35 = vmax.f32 %v208_v30, %v210_v31  ;;  %v188_v36 = vsel %vm187_vm9, %v157_v32, -inf  ;;  %v197_v37 = vsel %vm196_vm10, %v157_v32, -inf  ;;  %v1030_v32 = vld [vmem:[%s1526_s4] ss:$0 sm:$0xff] }
  0xee   :  { %v189_v38 = vmax.f32 %v186_v34, %v188_v36  ;;  %v200_v39 = vmax.f32 %v197_v37, %v199_v33  ;;  %v341_v37 = vld [vmem:[%s1527_s2] sm:$0x1]  ;;  %s1277_s2 = smov 32  }
  0xef   :  { %v212_v40 = vrot.slane %v211_v35, 4 }
  0xf0   :  { %v190_v41 = vrot.slane %v189_v38, 4  ;;  %v201_v42 = vrot.slane %v200_v39, 4 }
  0xf1   :  { %v213_v43 = vmax.f32 %v211_v35, %v212_v40  ;;  %v1106_v44 = vpop.f32.mrb[4].mxu0 }
  0xf2   :  { %v191_v45 = vmax.f32 %v189_v38, %v190_v41  ;;  %v170_v46 = vpop.f32.mrb[5].mxu0  ;;  %v202_v47 = vmax.f32 %v200_v39, %v201_v42  ;;  %v237_v50 = vsel %vm196_vm10, %v1106_v44, -inf  ;;  %v229_v59 = vsel %vm187_vm9, %v1106_v44, -inf  ;;  %v1435_v44 = vpop.permute.xlu0 %428 }
  0xf3   :  { %v214_v48 = vrot.slane %v213_v43, 2  ;;  %v220_v51 = vsel %vm185_vm8, %v170_v46, -inf  ;;  %v1107_v52 = vpop.f32.mrb[6].mxu0  ;;  %v449_v38 = vlaneseq }
  0xf4   :  { %v192_v53 = vrot.slane %v191_v45, 2  ;;  %v221_v54 = vmax.f32 %v219_v49, %v220_v51  ;;  %v203_v55 = vrot.slane %v202_v47, 2  ;;  %v238_v56 = vsel %vm198_vm7, %v1107_v52, -inf  ;;  %v173_v57 = vpop.f32.mrb[7].mxu0  ;;  %v1034_v52 = vld [vmem:[%s1529_s7] ss:$0 sm:$0xff] }
  0xf5   :  { %v215_v58 = vmax.f32 %v213_v43, %v214_v48  ;;  %v239_v60 = vmax.f32 %v237_v50, %v238_v56  ;;  %v228_v61 = vsel %vm185_vm8, %v173_v57, -inf  ;;  %v450_v43 = vshrl.u32 %v449_v38, 7  ;;  %v268_v50 = vld [vmem:[%s1528_s1] sm:$0x3f]  ;;  %s1278_s1 = smov 96  }
  0xf6   :  { %v193_v62 = vmax.f32 %v191_v45, %v192_v53  ;;  %v222_v63 = vrot.slane %v221_v54, 4  ;;  %v204_v0 = vmax.f32 %v202_v47, %v203_v55  ;;  %v230_v1 = vmax.f32 %v228_v61, %v229_v59 }
  0xf7   :  { %v216_v2 = vrot.slane %v215_v58, 1  ;;  %v240_v3 = vrot.slane %v239_v60, 4  ;;  %v451_v45 = vsub.s32 0, %v450_v43 }
  0xf8   :  { %v194_v4 = vrot.slane %v193_v62, 1  ;;  %v223_v5 = vmax.f32 %v221_v54, %v222_v63  ;;  %v205_v6 = vrot.slane %v204_v0, 1  ;;  %v231_v7 = vrot.slane %v230_v1, 4 }
  0xf9   :  { %v241_v8 = vmax.f32 %v239_v60, %v240_v3  ;;  %v217_v13 = vmax.f32 %v215_v58, %v216_v2  ;;  %v452_v49 = vrot.slane %v341_v37, %v451_v45 }
  0xfa   :  { %v195_v9 = vmax.f32 %v193_v62, %v194_v4  ;;  %v224_v10 = vrot.slane %v223_v5, 2  ;;  %v206_v11 = vmax.f32 %v204_v0, %v205_v6  ;;  %v232_v12 = vmax.f32 %v230_v1, %v231_v7 }
  0xfb   :  { %v242_v15 = vrot.slane %v241_v8, 2 }
  0xfc   :  { %v225_v16 = vmax.f32 %v223_v5, %v224_v10  ;;  %v247_v17 = vsel %vm246_vm12, %v195_v9, %v206_v11  ;;  %v233_v18 = vrot.slane %v232_v12, 2 }
  0xfd   :  { %v243_v20 = vmax.f32 %v241_v8, %v242_v15  ;;  %v249_v21 = vsel %vm248_vm13, %v247_v17, %v217_v13 }
  0xfe   :  { %v226_v23 = vrot.slane %v225_v16, 1  ;;  %v234_v24 = vmax.f32 %v232_v12, %v233_v18 }
  0xff   :  { %v244_v26 = vrot.slane %v243_v20, 1 }
 0x100   :  { %v227_v27 = vmax.f32 %v225_v16, %v226_v23  ;;  %v235_v28 = vrot.slane %v234_v24, 1 }
 0x101   :  { %v245_v31 = vmax.f32 %v243_v20, %v244_v26 }
 0x102   :  { %v236_v29 = vmax.f32 %v234_v24, %v235_v28  ;;  %v251_v30 = vsel %vm250_vm14, %v249_v21, %v227_v27 }
 0x104   :  { %v253_v33 = vsel %vm252_vm3, %v251_v30, %v236_v29 }
 0x105   :  { %v254_v34 = vsel %vm113_vm0, %v253_v33, %v245_v31 }
 0x106   :  { %v262_v35 = vadd.f32 %v1030_v32, %v254_v34 }
 0x108   :  { %v263_v36 = vpack.c.bf16 %v262_v35, %v262_v35 }
 0x10a   :  { %1113 = vmatmul.mubr.msk.bf16.vlgmr.msra.gmra.mrb[0].mxu1 %vm185_vm8, %v263_v36 }
 0x10b   :  { %1184 = vmatpush3.bf16.msra.mxu1 %v1383_v22  ;;  %1124 = vmatprep.mubr.msk.f32.mxu1 %vm1274_vm4, %v1273_v14 }
 0x10c   :  { %1185 = vmatprep.subr.bf16.mxu1 %v1275_v19 }
 0x10f   :  { %1187 = vmatpush3.bf16.msra.mxu1 %v1393_v25 }
 0x110   :  { %1188 = vmatprep.subr.bf16.mxu1 %v1275_v19 }
 0x112   :  { %1125 = vmatmul.mubr.msk.f32.vlgmr.msra.gmra.mrb[4].mxu1 %vm342_vm15, %v341_v37 }
 0x113   :  { %1190 = vmatpush3.bf16.msra.mxu1 %v1383_v22  ;;  %1135 = vmatprep.mubr.msk.f32.mxu1 %vm1274_vm4, %v1273_v14 }
 0x114   :  { %1191 = vmatprep.subr.bf16.mxu1 %v1275_v19 }
 0x117   :  { %1193 = vmatpush3.bf16.msra.mxu1 %v1393_v25 }
 0x118   :  { %1194 = vmatprep.subr.bf16.mxu1 %v1275_v19 }
 0x1dd   :  { %v322_v39 = vpop.f32.mrb[0].mxu1 }
 0x1de   :  { %v1114_v40 = vpop.f32.mrb[1].mxu1  ;;  %v323_v51 = vadd.f32 %v322_v39, %v268_v50 }
 0x1df   :  { %v325_v41 = vpop.f32.mrb[2].mxu1 }
 0x1e0   :  { %v1115_v42 = vpop.f32.mrb[3].mxu1  ;;  %v1445_v53 = vadd.f32 %v1034_v52, %v323_v51 }
 0x1e5   :  { %v412_v46 = vpop.f32.mrb[4].mxu1 }
 0x1e6   :  { %v431_v47 = vadd.f32 %v1435_v44, %v412_v46  ;;  %v1126_v48 = vpop.f32.mrb[5].mxu1  ;;  %v416_v54 = vadd.f32 %v412_v46, %v1445_v53 }
 0x1e8   :  { %433 = vrot.lane.b32.xlu0 %v431_v47, %s1276_s17  ;;  %v1036_v55 = vmul.f32 -1.442695, %v416_v54 }
 0x1ea   :  { %1236 = vpow2.f32 %v1036_v55 }
 0x1ec   :  { %453 = vrot.lane.b32.xlu0 %v452_v49, %s1277_s2 }
 0x1f4   :  { %v1237_v56 = vpop.eup %1236 }
 0x1f5   :  { %v420_v57 = vadd.f32 1.0, %v1237_v56 }
 0x1f7   :  { %1238 = vrcp.f32 %v420_v57 }
 0x201   :  { %v1239_v58 = vpop.eup %1238 }
 0x202   :  { %v443_v1 = vsub.f32 1.0, %v1239_v58 }
 0x25a   :  { %v434_v59 = vpop.permute.xlu0 %433 }
 0x25b   :  { %v436_v60 = vmul.f32 %v1239_v58, %v434_v59 }
 0x25d   :  { %438 = vrot.lane.b32.xlu1 %v436_v60, %s1276_s17 }
 0x25e   :  { %v454_v0 = vpop.permute.xlu0 %453 }
 0x25f   :  { %v456_v3 = vmul.f32 %v1239_v58, %v454_v0 }
 0x2cf   :  { %v439_v61 = vpop.permute.xlu1 %438 }
 0x2d0   :  { %v441_v62 = vadd.f32 %v439_v61, %v1445_v53 }
 0x2d2   :  { %1240 = vtanh.f32 %v441_v62 }
 0x2dc   :  { %v1241_v63 = vpop.eup %1240 }
 0x2dd   :  { %445 = vrot.lane.b32.xlu1 %v1241_v63, %s1278_s1 }
 0x34f   :  { %v446_v2 = vpop.permute.xlu1 %445 }
 0x350   :  { %v448_v4 = vmul.f32 %v446_v2, %v443_v1 }
 0x352   :  { %v1451_v5 = vadd.f32 %v456_v3, %v448_v4 }
 0x354   :  { %459 = vrot.lane.b32.xlu1 %v1451_v5, %s1278_s1  ;;  %v562_v27 = vrot.slane %v1451_v5, 7 }
 0x3c6   :  { %v460_v6 = vpop.permute.xlu1 %459 }
 0x3c7   :  { %1136 = vmatmul.mubr.msk.f32.vlgmr.msra.gmra.mrb[6].mxu1 %vm342_vm15, %v460_v6 }
 0x3c8   :  { %1196 = vmatpush3.bf16.msra.mxu1 %v1383_v22  ;;  %1146 = vmatprep.mubr.msk.f32.mxu1 %vm1274_vm4, %v1273_v14 }
 0x3c9   :  { %1197 = vmatprep.subr.bf16.mxu1 %v1275_v19 }
 0x3cc   :  { %1199 = vmatpush3.bf16.msra.mxu1 %v1393_v25 }
 0x3cd   :  { %1206 = vmatprep.subr.bf16.mxu1 %v1275_v19 }
 0x49a   :  { %v529_v7 = vpop.f32.mrb[6].mxu1 }
 0x49b   :  { %v543_v8 = vadd.f32 %v529_v7, %v1435_v44  ;;  %v1137_v9 = vpop.f32.mrb[7].mxu1  ;;  %v534_v11 = vrot.slane %v529_v7, 7 }
 0x49d   :  { %v545_v10 = vrot.slane %v543_v8, 7  ;;  %v536_v12 = vadd.f32 %v534_v11, %v1445_v53 }
 0x49f   :  { %546 = vrot.lane.b32.xlu0 %v545_v10, %s1276_s17  ;;  %v1039_v13 = vmul.f32 -1.442695, %v536_v12 }
 0x4a1   :  { %1242 = vpow2.f32 %v1039_v13 }
 0x4ab   :  { %v1243_v15 = vpop.eup %1242 }
 0x4ac   :  { %v540_v16 = vadd.f32 1.0, %v1243_v15 }
 0x4ae   :  { %1244 = vrcp.f32 %v540_v16 }
 0x4b8   :  { %v1245_v17 = vpop.eup %1244 }
 0x4b9   :  { %v556_v26 = vsub.f32 1.0, %v1245_v17  ;;  %v564_v29 = vmul.f32 %v1245_v17, %v562_v27 }
 0x511   :  { %v547_v18 = vpop.permute.xlu0 %546 }
 0x512   :  { %v549_v20 = vmul.f32 %v1245_v17, %v547_v18 }
 0x514   :  { %551 = vrot.lane.b32.xlu1 %v549_v20, %s1276_s17 }
 0x586   :  { %v552_v21 = vpop.permute.xlu1 %551 }
 0x587   :  { %v554_v23 = vadd.f32 %v552_v21, %v1445_v53 }
 0x589   :  { %1246 = vtanh.f32 %v554_v23 }
 0x593   :  { %v1247_v24 = vpop.eup %1246 }
 0x594   :  { %558 = vrot.lane.b32.xlu0 %v1247_v24, %s1278_s1 }
 0x606   :  { %v559_v28 = vpop.permute.xlu0 %558 }
 0x607   :  { %v561_v30 = vmul.f32 %v559_v28, %v556_v26 }
 0x609   :  { %v565_v31 = vadd.f32 %v564_v29, %v561_v30 }
 0x60b   :  { %v567_v32 = vrot.slane %v565_v31, 1  ;;  %v671_v51 = vrot.slane %v565_v31, 7  ;;  %v1002_v57 = vsel %vm246_vm12, %v1451_v5, %v565_v31 }
 0x60d   :  { %568 = vrot.lane.b32.xlu1 %v567_v32, %s1278_s1 }
 0x67f   :  { %v569_v33 = vpop.permute.xlu1 %568 }
 0x680   :  { %1147 = vmatmul.mubr.msk.f32.vlgmr.msra.gmra.mrb[8].mxu1 %vm342_vm15, %v569_v33 }
 0x681   :  { %1208 = vmatpush3.bf16.msra.mxu1 %v1383_v22  ;;  %1168 = vmatprep.mubr.msk.f32.mxu1 %vm1274_vm4, %v1273_v14 }
 0x682   :  { %1209 = vmatprep.subr.bf16.mxu1 %v1275_v19 }
 0x685   :  { %1211 = vmatpush3.bf16.msra.mxu1 %v1393_v25 }
 0x753   :  { %v638_v34 = vpop.f32.mrb[8].mxu1 }
 0x754   :  { %v652_v35 = vadd.f32 %v638_v34, %v1435_v44  ;;  %v1148_v36 = vpop.f32.mrb[9].mxu1  ;;  %v643_v38 = vrot.slane %v638_v34, 6 }
 0x756   :  { %v654_v37 = vrot.slane %v652_v35, 6  ;;  %v645_v39 = vadd.f32 %v643_v38, %v1445_v53 }
 0x758   :  { %655 = vrot.lane.b32.xlu0 %v654_v37, %s1276_s17  ;;  %v1041_v40 = vmul.f32 -1.442695, %v645_v39 }
 0x75a   :  { %1248 = vpow2.f32 %v1041_v40 }
 0x764   :  { %v1249_v41 = vpop.eup %1248 }
 0x765   :  { %v649_v42 = vadd.f32 1.0, %v1249_v41 }
 0x767   :  { %1250 = vrcp.f32 %v649_v42 }
 0x771   :  { %v1251_v43 = vpop.eup %1250 }
 0x772   :  { %v665_v50 = vsub.f32 1.0, %v1251_v43  ;;  %v673_v54 = vmul.f32 %v1251_v43, %v671_v51 }
 0x7ca   :  { %v656_v45 = vpop.permute.xlu0 %655 }
 0x7cb   :  { %v658_v46 = vmul.f32 %v1251_v43, %v656_v45 }
 0x7cd   :  { %660 = vrot.lane.b32.xlu1 %v658_v46, %s1276_s17 }
 0x83f   :  { %v661_v47 = vpop.permute.xlu1 %660 }
 0x840   :  { %v663_v48 = vadd.f32 %v661_v47, %v1445_v53 }
 0x842   :  { %1252 = vtanh.f32 %v663_v48 }
 0x84c   :  { %v1253_v49 = vpop.eup %1252 }
 0x84d   :  { %667 = vrot.lane.b32.xlu0 %v1253_v49, %s1278_s1 }
 0x8bf   :  { %v668_v52 = vpop.permute.xlu0 %667 }
 0x8c0   :  { %v670_v55 = vmul.f32 %v668_v52, %v665_v50 }
 0x8c2   :  { %v674_v56 = vadd.f32 %v673_v54, %v670_v55 }
 0x8c4   :  { %v1003_v58 = vsel %vm248_vm13, %v1002_v57, %v674_v56  ;;  %v676_v59 = vrot.slane %v674_v56, 2  ;;  %v780_v9 = vrot.slane %v674_v56, 7 }
 0x8c6   :  { %677 = vrot.lane.b32.xlu1 %v676_v59, %s1278_s1 }
 0x938   :  { %v678_v60 = vpop.permute.xlu1 %677 }
 0x939   :  { %1158 = vmatmul.mubr.msk.f32.vlgmr.msra.gmra.mrb[8].mxu0 %vm342_vm15, %v678_v60 }
 0x93a   :  { %1214 = vmatpush3.bf16.msra.mxu0 %v1383_v22  ;;  %1179 = vmatprep.mubr.msk.f32.mxu0 %vm1274_vm4, %v1273_v14 }
 0x93b   :  { %1215 = vmatprep.subr.bf16.mxu0 %v1275_v19 }
 0x93e   :  { %1217 = vmatpush3.bf16.msra.mxu0 %v1393_v25 }
 0xa0c   :  { %v747_v61 = vpop.f32.mrb[8].mxu0 }
 0xa0d   :  { %v761_v62 = vadd.f32 %v747_v61, %v1435_v44  ;;  %v1159_v63 = vpop.f32.mrb[9].mxu0  ;;  %v752_v1 = vrot.slane %v747_v61, 5 }
 0xa0f   :  { %v763_v0 = vrot.slane %v761_v62, 5  ;;  %v754_v2 = vadd.f32 %v752_v1, %v1445_v53 }
 0xa11   :  { %764 = vrot.lane.b32.xlu0 %v763_v0, %s1276_s17  ;;  %v1043_v3 = vmul.f32 -1.442695, %v754_v2 }
 0xa13   :  { %1254 = vpow2.f32 %v1043_v3 }
 0xa1d   :  { %v1255_v22 = vpop.eup %1254 }
 0xa1e   :  { %v758_v4 = vadd.f32 1.0, %v1255_v22 }
 0xa20   :  { %1256 = vrcp.f32 %v758_v4 }
 0xa2a   :  { %v1257_v14 = vpop.eup %1256 }
 0xa2b   :  { %v774_v8 = vsub.f32 1.0, %v1257_v14  ;;  %v782_v11 = vmul.f32 %v1257_v14, %v780_v9 }
 0xa83   :  { %v765_v5 = vpop.permute.xlu0 %764 }
 0xa84   :  { %v767_v19 = vmul.f32 %v1257_v14, %v765_v5 }
 0xa86   :  { %769 = vrot.lane.b32.xlu1 %v767_v19, %s1276_s17 }
 0xaf8   :  { %v770_v25 = vpop.permute.xlu1 %769 }
 0xaf9   :  { %v772_v6 = vadd.f32 %v770_v25, %v1445_v53 }
 0xafb   :  { %1258 = vtanh.f32 %v772_v6 }
 0xb05   :  { %v1259_v7 = vpop.eup %1258 }
 0xb06   :  { %776 = vrot.lane.b32.xlu0 %v1259_v7, %s1278_s1 }
 0xb78   :  { %v777_v10 = vpop.permute.xlu0 %776 }
 0xb79   :  { %v779_v12 = vmul.f32 %v777_v10, %v774_v8 }
 0xb7b   :  { %v783_v13 = vadd.f32 %v782_v11, %v779_v12 }
 0xb7d   :  { %v785_v15 = vrot.slane %v783_v13, 3  ;;  %v1004_v16 = vsel %vm250_vm14, %v1003_v58, %v783_v13  ;;  %v889_v37 = vrot.slane %v783_v13, 7 }
 0xb7f   :  { %786 = vrot.lane.b32.xlu1 %v785_v15, %s1278_s1 }
 0xbf1   :  { %v787_v17 = vpop.permute.xlu1 %786 }
 0xbf2   :  { %1169 = vmatmul.mubr.msk.f32.vlgmr.msra.gmra.mrb[10].mxu1 %vm342_vm15, %v787_v17 }
 0xcc5   :  { %v856_v18 = vpop.f32.mrb[10].mxu1 }
 0xcc6   :  { %v870_v20 = vadd.f32 %v856_v18, %v1435_v44  ;;  %v1170_v21 = vpop.f32.mrb[11].mxu1  ;;  %v861_v24 = vrot.slane %v856_v18, 4 }
 0xcc8   :  { %v872_v23 = vrot.slane %v870_v20, 4  ;;  %v863_v26 = vadd.f32 %v861_v24, %v1445_v53 }
 0xcca   :  { %873 = vrot.lane.b32.xlu0 %v872_v23, %s1276_s17  ;;  %v1045_v27 = vmul.f32 -1.442695, %v863_v26 }
 0xccc   :  { %1260 = vpow2.f32 %v1045_v27 }
 0xcd6   :  { %v1261_v28 = vpop.eup %1260 }
 0xcd7   :  { %v867_v29 = vadd.f32 1.0, %v1261_v28 }
 0xcd9   :  { %1262 = vrcp.f32 %v867_v29 }
 0xce3   :  { %v1263_v30 = vpop.eup %1262 }
 0xce4   :  { %v883_v36 = vsub.f32 1.0, %v1263_v30  ;;  %v891_v39 = vmul.f32 %v1263_v30, %v889_v37 }
 0xd3c   :  { %v874_v31 = vpop.permute.xlu0 %873 }
 0xd3d   :  { %v876_v32 = vmul.f32 %v1263_v30, %v874_v31 }
 0xd3f   :  { %878 = vrot.lane.b32.xlu1 %v876_v32, %s1276_s17 }
 0xdb1   :  { %v879_v33 = vpop.permute.xlu1 %878 }
 0xdb2   :  { %v881_v34 = vadd.f32 %v879_v33, %v1445_v53 }
 0xdb4   :  { %1264 = vtanh.f32 %v881_v34 }
 0xdbe   :  { %v1265_v35 = vpop.eup %1264 }
 0xdbf   :  { %885 = vrot.lane.b32.xlu0 %v1265_v35, %s1278_s1 }
 0xe31   :  { %v886_v38 = vpop.permute.xlu0 %885 }
 0xe32   :  { %v888_v40 = vmul.f32 %v886_v38, %v883_v36 }
 0xe34   :  { %v892_v41 = vadd.f32 %v891_v39, %v888_v40 }
 0xe36   :  { %v894_v42 = vrot.slane %v892_v41, 4  ;;  %v1005_v43 = vsel %vm252_vm3, %v1004_v16, %v892_v41  ;;  %v998_v62 = vrot.slane %v892_v41, 7 }
 0xe38   :  { %895 = vrot.lane.b32.xlu1 %v894_v42, %s1278_s1 }
 0xeaa   :  { %v896_v45 = vpop.permute.xlu1 %895 }
 0xeab   :  { %1180 = vmatmul.mubr.msk.f32.vlgmr.msra.gmra.mrb[10].mxu0 %vm342_vm15, %v896_v45 }
 0xf7e   :  { %v965_v46 = vpop.f32.mrb[10].mxu0 }
 0xf7f   :  { %v979_v47 = vadd.f32 %v965_v46, %v1435_v44  ;;  %v1181_v48 = vpop.f32.mrb[11].mxu0  ;;  %v970_v50 = vrot.slane %v965_v46, 3 }
 0xf81   :  { %v981_v49 = vrot.slane %v979_v47, 3  ;;  %v972_v51 = vadd.f32 %v970_v50, %v1445_v53 }
 0xf83   :  { %982 = vrot.lane.b32.xlu0 %v981_v49, %s1276_s17  ;;  %v1047_v52 = vmul.f32 -1.442695, %v972_v51 }
 0xf85   :  { %1266 = vpow2.f32 %v1047_v52 }
 0xf8f   :  { %v1267_v54 = vpop.eup %1266 }
 0xf90   :  { %v976_v55 = vadd.f32 1.0, %v1267_v54 }
 0xf92   :  { %1268 = vrcp.f32 %v976_v55 }
 0xf9c   :  { %v1269_v56 = vpop.eup %1268 }
 0xf9d   :  { %v992_v61 = vsub.f32 1.0, %v1269_v56  ;;  %v1000_v0 = vmul.f32 %v1269_v56, %v998_v62 }
 0xff5   :  { %v983_v57 = vpop.permute.xlu0 %982 }
 0xff6   :  { %v985_v58 = vmul.f32 %v1269_v56, %v983_v57 }
 0xff8   :  { %987 = vrot.lane.b32.xlu1 %v985_v58, %s1276_s17 }
0x106a   :  { %v988_v59 = vpop.permute.xlu1 %987 }
0x106b   :  { %v990_v44 = vadd.f32 %v988_v59, %v1445_v53 }
0x106d   :  { %1270 = vtanh.f32 %v990_v44 }
0x1077   :  { %v1271_v60 = vpop.eup %1270 }
0x1078   :  { %994 = vrot.lane.b32.xlu0 %v1271_v60, %s1278_s1 }
0x10ea   :  { %v995_v63 = vpop.permute.xlu0 %994 }
0x10eb   :  { %v997_v1 = vmul.f32 %v995_v63, %v992_v61 }
0x10ed   :  { %v1001_v2 = vadd.f32 %v1000_v0, %v997_v1 }
0x10ef   :  { %v1006_v3 = vsel %vm113_vm0, %v1005_v43, %v1001_v2 }
0x10f0   :  { %1008 = vrot.lane.b32.xlu1 %v1006_v3, %s1278_s1 }
0x1162   :  { %v1009_v22 = vpop.permute.xlu1 %1008 }
0x1163   :  { %1012 = vst.msk [vmem:[%s1530_s9] sm:$0x3f] %vm1011_vm1, %v1009_v22 }

</bundles_post_ra>
